<compile_context>
chip_gen: v7x
topology: tpu7x:2x2x1
jax: 0.10.0
libtpu: 0.0.40
codegen_flags: <defaults>
</compile_context>

<pallas_src>
import jax
import jax.numpy as jnp
from jax import lax
from jax.experimental import pallas as pl
from jax.experimental.pallas import tpu as pltpu

EPS = 1e-5       # nn.LayerNorm default eps
K = 3            # kernel_size
MAX_TL = 1024    # max sequence-tile (lane) width per grid step


def _ln_over_channels(y):
    # y: (C, T) float32.  LayerNorm over the channel (sublane) axis,
    # elementwise_affine=False -> matches ConvLayerNorm exactly.
    mu = jnp.mean(y, axis=0, keepdims=True)
    var = jnp.mean(jnp.square(y - mu), axis=0, keepdims=True)
    return (y - mu) * lax.rsqrt(var + EPS)


def _tap_conv(w_taps_ref, src, out_w):
    # 3-tap "same" conv as per-tap MXU dots over a haloed source; output
    # column c corresponds to source columns c, c+1, c+2.
    acc = jnp.dot(w_taps_ref[0], src[:, 0:out_w],
                  preferred_element_type=jnp.float32)
    acc = acc + jnp.dot(w_taps_ref[1], src[:, 1:out_w + 1],
                        preferred_element_type=jnp.float32)
    acc = acc + jnp.dot(w_taps_ref[2], src[:, 2:out_w + 2],
                        preferred_element_type=jnp.float32)
    return acc


def _make_kernel(tl, seq_len, has_sc, fuse_conv2):
    def body(xw_ref, w1_ref, w2_ref, wsc_ref, o_ref):
        j = pl.program_id(1)
        xw = xw_ref[0, 0]                              # (Cin, tl+4), input dtype

        # conv1 over the tl+2 haloed positions [j*tl-1, j*tl+tl] that conv2
        # needs; Cin is often small/unaligned so the 3-tap form is kept here.
        h = _tap_conv(w1_ref, xw, tl + 2)              # (Cout, tl+2) f32
        h = jnp.maximum(_ln_over_channels(h), 0.0)
        # TODO(synk): nn.Dropout(p=0.05) treated as identity (eval mode).

        # Zero the halo columns that fall outside [0, seq_len): conv2's zero
        # padding feeds exact zeros there, while relu(LN(conv1(zero-padded x)))
        # would not.  One VPU compare+select; replaces the 3x zero-im2col trick.
        pos = j * tl - 1 + lax.broadcasted_iota(jnp.int32, h.shape, 1)
        h = jnp.where((pos >= 0) & (pos < seq_len), h, 0.0)
        h = h.astype(xw.dtype)      # keep MXU operands in the input dtype

        if fuse_conv2:
            # Fused conv2: one deep (Cout, 3*Cout) @ (3*Cout, tl) contraction
            # (fills the 256-deep v6e/v7x MXU; one push/pop instead of three).
            h_stack = jnp.concatenate(
                [h[:, 0:tl], h[:, 1:tl + 1], h[:, 2:tl + 2]], axis=0)
            out = jnp.dot(w2_ref[...], h_stack,
                          preferred_element_type=jnp.float32)
        else:
            out = _tap_conv(w2_ref, h, tl)
        out = _ln_over_channels(out)

        # Shortcut input sliced straight out of the haloed window
        # (positions [j*tl, j*tl+tl)); no second HBM stream for x.
        xs = xw[:, 2:tl + 2]
        if has_sc:
            sc = _ln_over_channels(
                jnp.dot(wsc_ref[...], xs, preferred_element_type=jnp.float32))
        else:
            sc = xs.astype(jnp.float32)

        o_ref[0] = jnp.maximum(out + sc, 0.0).astype(o_ref.dtype)

    if has_sc:
        return body

    def body_nosc(xw_ref, w1_ref, w2_ref, o_ref):
        body(xw_ref, w1_ref, w2_ref, None, o_ref)

    return body_nosc


def _choose_tile(seq_len, batch):
    if seq_len > MAX_TL:
        tl = MAX_TL
    elif batch == 1 and seq_len >= 256:
        # Keep >= 2 grid steps so both v7x TensorCores get work for batch == 1.
        tl = 128 * ((((seq_len + 1) // 2) + 127) // 128)
    else:
        tl = seq_len
    n_lt = -(-seq_len // tl)
    return tl, n_lt


@jax.jit
def resblockv2_forward(x_ncl, w1, w2, w_sc=None):
    """ResBlockv2 forward (eval mode), NCL layout end-to-end.

    x_ncl: (N, Cin, L)     w1: (Cout, Cin, K)     w2: (Cout, Cout, K)
    w_sc:  (Cout, Cin, 1) or None (identity shortcut; requires Cin == Cout)
    """
    # TODO(synk): stride != 1 and the norm='batch' (BatchNorm1d) variant are not
    # implemented; the module defaults (stride=1, norm='layer', bias=False) are.
    N, Cin, L = x_ncl.shape
    Cout = w1.shape[0]
    assert w1.shape == (Cout, Cin, K) and w2.shape == (Cout, Cout, K)
    has_sc = w_sc is not None
    if not has_sc:
        assert Cin == Cout, "identity shortcut requires in_channels == out_channels"

    dt = x_ncl.dtype
    isz = jnp.dtype(dt).itemsize
    tl, n_lt = _choose_tile(L, N)
    l_pad = tl * n_lt

    # ---- per-tile haloed RAW windows of x (no im2col: ~1.004x duplication) ----
    # Window j covers positions [j*tl-2, j*tl+tl+1] (width tl+4): enough for the
    # kernel to form conv1 on the tl+2 haloed positions conv2 needs, plus the
    # un-haloed shortcut slice, from this single input stream.
    x_pad = jnp.pad(x_ncl, ((0, 0), (0, 0), (2, l_pad + 2 - L)))
    if n_lt <= 32:
        x_win = jnp.stack(
            [lax.slice_in_dim(x_pad, j * tl, j * tl + tl + 4, axis=2)
             for j in range(n_lt)], axis=1)            # (N, n_lt, Cin, tl+4)
    else:
        idx = (jnp.arange(n_lt) * tl)[:, None] + jnp.arange(tl + 4)[None, :]
        x_win = jnp.take(x_pad, idx.reshape(-1), axis=2)
        x_win = x_win.reshape(N, Cin, n_lt, tl + 4).transpose(0, 2, 1, 3)

    # ---- weights folded / cast once in the wrapper (grid-invariant) ----
    w1_taps = jnp.transpose(w1, (2, 0, 1)).astype(dt)      # (K, Cout, Cin)
    fuse_conv2 = (Cout % 8 == 0)
    if fuse_conv2:
        # w2f[o, k*Cout + c] = w2[o, c, k]  -> single deep contraction in-kernel.
        w2_arg = jnp.transpose(w2, (0, 2, 1)).reshape(Cout, K * Cout).astype(dt)
        w2_spec = pl.BlockSpec((Cout, K * Cout), lambda b, j: (0, 0))
    else:
        w2_arg = jnp.transpose(w2, (2, 0, 1)).astype(dt)   # (K, Cout, Cout)
        w2_spec = pl.BlockSpec((K, Cout, Cout), lambda b, j: (0, 0, 0))

    in_specs = [
        pl.BlockSpec((1, 1, Cin, tl + 4), lambda b, j: (b, j, 0, 0)),
        pl.BlockSpec((K, Cout, Cin), lambda b, j: (0, 0, 0)),
        w2_spec,
    ]
    args = [x_win, w1_taps, w2_arg]
    if has_sc:
        in_specs.append(pl.BlockSpec((Cout, Cin), lambda b, j: (0, 0)))
        args.append(w_sc[:, :, 0].astype(dt))

    # ---- VMEM budget derived from the actual per-step buffers ----
    weights_elems = K * Cout * Cin + K * Cout * Cout + (Cout * Cin if has_sc else 0)
    pipelined = 2 * (Cin * (tl + 4) + Cout * tl) * isz     # double-buffered in/out
    resident = 2 * weights_elems * isz                     # grid-invariant weights
    # TODO(synk): weights are still double-buffered by the default pipeliner;
    # single-buffering them (or a one-time DMA to scratch) would halve `resident`.
    work = 4 * (4 * Cin + 10 * Cout) * (tl + 4)            # f32 working-set estimate
    vmem_limit = int(min(max(2 * (pipelined + resident + work), 8 << 20), 32 << 20))

    flops = 2 * N * L * (K * Cin * Cout + K * Cout * Cout
                         + (Cin * Cout if has_sc else 0))
    bytes_accessed = (x_win.size + N * Cout * l_pad + weights_elems) * isz
    cost = pl.CostEstimate(flops=flops,
                           transcendentals=N * L * (3 if has_sc else 2),
                           bytes_accessed=bytes_accessed)

    out = pl.pallas_call(
        _make_kernel(tl, L, has_sc, fuse_conv2),
        out_shape=jax.ShapeDtypeStruct((N, Cout, l_pad), dt),
        grid_spec=pltpu.PrefetchScalarGridSpec(
            num_scalar_prefetch=0,
            grid=(N, n_lt),
            in_specs=in_specs,
            out_specs=pl.BlockSpec((1, Cout, tl), lambda b, j: (b, 0, j)),
        ),
        compiler_params=pltpu.CompilerParams(
            dimension_semantics=("parallel", "parallel"),
            vmem_limit_bytes=vmem_limit,
        ),
        cost_estimate=cost,
    )(*args)
    return out[:, :, :L] if l_pad != L else out


def _ref_forward(x_ncl, w1, w2, w_sc):
    # Pure-JAX reference mirroring the PyTorch forward (eval mode).
    x = jnp.transpose(x_ncl, (0, 2, 1)).astype(jnp.float32)   # (N, L, Cin)

    def conv(xnlc, w):
        wk = jnp.transpose(w, (2, 1, 0)).astype(jnp.float32)
        kk, ll = wk.shape[0], xnlc.shape[1]
        xp = jnp.pad(xnlc, ((0, 0), (1, 1), (0, 0)))
        return sum(jnp.einsum('nlc,cd->nld', xp[:, t:t + ll], wk[t])
                   for t in range(kk))

    def ln(y):
        mu = jnp.mean(y, -1, keepdims=True)
        var = jnp.mean((y - mu) ** 2, -1, keepdims=True)
        return (y - mu) / jnp.sqrt(var + EPS)

    out = jnp.maximum(ln(conv(x, w1)), 0.0)
    out = ln(conv(out, w2))
    if w_sc is not None:
        wsck = jnp.transpose(w_sc[:, :, 0], (1, 0)).astype(jnp.float32)
        sc = ln(jnp.einsum('nlc,cd->nld', x, wsck))
    else:
        sc = x
    out = jnp.maximum(out + sc, 0.0)
    return jnp.transpose(out, (0, 2, 1))


if __name__ == "__main__":
    # Small shapes consistent with the module: batch=2, in_channels=4,
    # out_channels=8, seq_len=16, kernel_size=3, stride=1.
    N, Cin, Cout, L = 2, 4, 8, 16
    key = jax.random.PRNGKey(0)
    kx, k1, k2, k3 = jax.random.split(key, 4)

    x = jax.random.normal(kx, (N, Cin, L), dtype=jnp.float32)
    w1 = 0.2 * jax.random.normal(k1, (Cout, Cin, K), dtype=jnp.float32)
    w2 = 0.2 * jax.random.normal(k2, (Cout, Cout, K), dtype=jnp.float32)
    w_sc = 0.2 * jax.random.normal(k3, (Cout, Cin, 1), dtype=jnp.float32)

    # Conv shortcut path (in_channels != out_channels).
    y = jax.block_until_ready(resblockv2_forward(x, w1, w2, w_sc))
    y_ref = _ref_forward(x, w1, w2, w_sc)
    assert y.shape == (N, Cout, L)
    # Tolerance leaves room for MXU f32 accumulation-order differences.
    assert jnp.allclose(y, y_ref, atol=2e-3, rtol=2e-3), "mismatch (conv shortcut)"

    # Identity shortcut path (in_channels == out_channels).
    x2 = jax.random.normal(kx, (N, Cout, L), dtype=jnp.float32)
    w1b = 0.2 * jax.random.normal(k1, (Cout, Cout, K), dtype=jnp.float32)
    y2 = jax.block_until_ready(resblockv2_forward(x2, w1b, w2, None))
    y2_ref = _ref_forward(x2, w1b, w2, None)
    assert jnp.allclose(y2, y2_ref, atol=2e-3, rtol=2e-3), "mismatch (identity shortcut)"

    print("KERNEL_OK")
</pallas_src>

<mosaic_0001>
module attributes {stable_mosaic.version = 11 : i64} {
  func.func @body(%arg0: i32, %arg1: i32, %arg2: memref<1x1x4x20xf32, #tpu.memory_space<vmem>>, %arg3: memref<3x8x4xf32, #tpu.memory_space<vmem>>, %arg4: memref<8x24xf32, #tpu.memory_space<vmem>>, %arg5: memref<8x4xf32, #tpu.memory_space<vmem>>, %arg6: memref<1x8x16xf32, #tpu.memory_space<vmem>>) attributes {dimension_semantics = [#tpu.dimension_semantics<parallel>, #tpu.dimension_semantics<parallel>], iteration_bounds = array<i64: 2, 1>, scalar_prefetch = 0 : i64, scratch_operands = 0 : i64, tpu.core_type = #tpu.core_type<tc>, window_params = [{transform_indices = @transform_0, window_bounds = array<i64: 1, 1, 4, 20>}, {pipeline_mode = #tpu.pipeline_mode<synchronous>, transform_indices = @transform_1, window_bounds = array<i64: 3, 8, 4>}, {pipeline_mode = #tpu.pipeline_mode<synchronous>, transform_indices = @transform_2, window_bounds = array<i64: 8, 24>}, {pipeline_mode = #tpu.pipeline_mode<synchronous>, transform_indices = @transform_3, window_bounds = array<i64: 8, 4>}, {transform_indices = @transform_4, window_bounds = array<i64: 1, 8, 16>}]} {
    %c0 = arith.constant 0 : index
    %c0_0 = arith.constant 0 : index
    %c0_1 = arith.constant 0 : index
    %c0_2 = arith.constant 0 : index
    %0 = vector.load %arg2[%c0, %c0_0, %c0_1, %c0_2] : memref<1x1x4x20xf32, #tpu.memory_space<vmem>>, vector<1x1x4x20xf32>
    %1 = vector.shape_cast %0 : vector<1x1x4x20xf32> to vector<4x20xf32>
    %c0_3 = arith.constant 0 : index
    %c0_4 = arith.constant 0 : index
    %c0_5 = arith.constant 0 : index
    %2 = vector.load %arg3[%c0_3, %c0_4, %c0_5] : memref<3x8x4xf32, #tpu.memory_space<vmem>>, vector<1x8x4xf32>
    %3 = vector.shape_cast %2 : vector<1x8x4xf32> to vector<8x4xf32>
    %4 = vector.extract_strided_slice %1 {offsets = [0, 0], sizes = [4, 18], strides = [1, 1]} : vector<4x20xf32> to vector<4x18xf32>
    %cst = arith.constant dense<0.000000e+00> : vector<8x18xf32>
    %5 = tpu.matmul %3, %4, %cst {dimension_numbers = #tpu.dot_dimension_numbers<[1], [0], [0], [1], [0, 0, 1, 1], [], []>} : vector<8x4xf32>, vector<4x18xf32>, vector<8x18xf32> -> vector<8x18xf32>
    %c1 = arith.constant 1 : index
    %c0_6 = arith.constant 0 : index
    %c0_7 = arith.constant 0 : index
    %6 = vector.load %arg3[%c1, %c0_6, %c0_7] : memref<3x8x4xf32, #tpu.memory_space<vmem>>, vector<1x8x4xf32>
    %7 = vector.shape_cast %6 : vector<1x8x4xf32> to vector<8x4xf32>
    %8 = vector.extract_strided_slice %1 {offsets = [0, 1], sizes = [4, 18], strides = [1, 1]} : vector<4x20xf32> to vector<4x18xf32>
    %cst_8 = arith.constant dense<0.000000e+00> : vector<8x18xf32>
    %9 = tpu.matmul %7, %8, %cst_8 {dimension_numbers = #tpu.dot_dimension_numbers<[1], [0], [0], [1], [0, 0, 1, 1], [], []>} : vector<8x4xf32>, vector<4x18xf32>, vector<8x18xf32> -> vector<8x18xf32>
    %10 = arith.addf %5, %9 : vector<8x18xf32>
    %c2 = arith.constant 2 : index
    %c0_9 = arith.constant 0 : index
    %c0_10 = arith.constant 0 : index
    %11 = vector.load %arg3[%c2, %c0_9, %c0_10] : memref<3x8x4xf32, #tpu.memory_space<vmem>>, vector<1x8x4xf32>
    %12 = vector.shape_cast %11 : vector<1x8x4xf32> to vector<8x4xf32>
    %13 = vector.extract_strided_slice %1 {offsets = [0, 2], sizes = [4, 18], strides = [1, 1]} : vector<4x20xf32> to vector<4x18xf32>
    %cst_11 = arith.constant dense<0.000000e+00> : vector<8x18xf32>
    %14 = tpu.matmul %12, %13, %cst_11 {dimension_numbers = #tpu.dot_dimension_numbers<[1], [0], [0], [1], [0, 0, 1, 1], [], []>} : vector<8x4xf32>, vector<4x18xf32>, vector<8x18xf32> -> vector<8x18xf32>
    %15 = arith.addf %10, %14 : vector<8x18xf32>
    %cst_12 = arith.constant dense<0.000000e+00> : vector<18xf32>
    %16 = vector.multi_reduction <add>, %15, %cst_12 [0] : vector<8x18xf32> to vector<18xf32>
    %17 = vector.shape_cast %16 : vector<18xf32> to vector<1x18xf32>
    %cst_13 = arith.constant 8.000000e+00 : f32
    %18 = vector.broadcast %cst_13 : f32 to vector<1x18xf32>
    %19 = arith.divf %17, %18 : vector<1x18xf32>
    %20 = vector.broadcast %19 : vector<1x18xf32> to vector<8x18xf32>
    %21 = arith.subf %15, %20 : vector<8x18xf32>
    %22 = arith.mulf %21, %21 : vector<8x18xf32>
    %cst_14 = arith.constant dense<0.000000e+00> : vector<18xf32>
    %23 = vector.multi_reduction <add>, %22, %cst_14 [0] : vector<8x18xf32> to vector<18xf32>
    %24 = vector.shape_cast %23 : vector<18xf32> to vector<1x18xf32>
    %cst_15 = arith.constant 8.000000e+00 : f32
    %25 = vector.broadcast %cst_15 : f32 to vector<1x18xf32>
    %26 = arith.divf %24, %25 : vector<1x18xf32>
    %27 = vector.broadcast %19 : vector<1x18xf32> to vector<8x18xf32>
    %28 = arith.subf %15, %27 : vector<8x18xf32>
    %cst_16 = arith.constant 9.99999974E-6 : f32
    %29 = vector.broadcast %cst_16 : f32 to vector<1x18xf32>
    %30 = arith.addf %26, %29 : vector<1x18xf32>
    %31 = math.rsqrt %30 : vector<1x18xf32>
    %32 = vector.broadcast %31 : vector<1x18xf32> to vector<8x18xf32>
    %33 = arith.mulf %28, %32 : vector<8x18xf32>
    %cst_17 = arith.constant 0.000000e+00 : f32
    %34 = vector.broadcast %cst_17 : f32 to vector<8x18xf32>
    %35 = arith.maximumf %33, %34 : vector<8x18xf32>
    %c16_i32 = arith.constant 16 : i32
    %36 = arith.muli %arg1, %c16_i32 : i32
    %c1_i32 = arith.constant 1 : i32
    %37 = arith.subi %36, %c1_i32 : i32
    %38 = tpu.iota {dimensions = array<i32: 1>} : vector<8x18xi32>
    %39 = vector.broadcast %37 : i32 to vector<8x18xi32>
    %40 = arith.addi %39, %38 : vector<8x18xi32>
    %c0_i32 = arith.constant 0 : i32
    %41 = vector.broadcast %c0_i32 : i32 to vector<8x18xi32>
    %42 = arith.cmpi sge, %40, %41 : vector<8x18xi32>
    %c16_i32_18 = arith.constant 16 : i32
    %43 = vector.broadcast %c16_i32_18 : i32 to vector<8x18xi32>
    %44 = arith.cmpi slt, %40, %43 : vector<8x18xi32>
    %45 = arith.andi %42, %44 : vector<8x18xi1>
    %cst_19 = arith.constant 0.000000e+00 : f32
    %46 = vector.broadcast %cst_19 : f32 to vector<8x18xf32>
    %47 = arith.select %45, %35, %46 : vector<8x18xi1>, vector<8x18xf32>
    %48 = vector.extract_strided_slice %47 {offsets = [0, 0], sizes = [8, 16], strides = [1, 1]} : vector<8x18xf32> to vector<8x16xf32>
    %49 = vector.extract_strided_slice %47 {offsets = [0, 1], sizes = [8, 16], strides = [1, 1]} : vector<8x18xf32> to vector<8x16xf32>
    %50 = vector.extract_strided_slice %47 {offsets = [0, 2], sizes = [8, 16], strides = [1, 1]} : vector<8x18xf32> to vector<8x16xf32>
    %51 = tpu.concatenate %48, %49, %50 in 0 : vector<8x16xf32>, vector<8x16xf32>, vector<8x16xf32> -> vector<24x16xf32>
    %c0_20 = arith.constant 0 : index
    %c0_21 = arith.constant 0 : index
    %52 = vector.load %arg4[%c0_20, %c0_21] : memref<8x24xf32, #tpu.memory_space<vmem>>, vector<8x24xf32>
    %cst_22 = arith.constant dense<0.000000e+00> : vector<8x16xf32>
    %53 = tpu.matmul %52, %51, %cst_22 {dimension_numbers = #tpu.dot_dimension_numbers<[1], [0], [0], [1], [0, 0, 1, 1], [], []>} : vector<8x24xf32>, vector<24x16xf32>, vector<8x16xf32> -> vector<8x16xf32>
    %cst_23 = arith.constant dense<0.000000e+00> : vector<16xf32>
    %54 = vector.multi_reduction <add>, %53, %cst_23 [0] : vector<8x16xf32> to vector<16xf32>
    %55 = vector.shape_cast %54 : vector<16xf32> to vector<1x16xf32>
    %cst_24 = arith.constant 8.000000e+00 : f32
    %56 = vector.broadcast %cst_24 : f32 to vector<1x16xf32>
    %57 = arith.divf %55, %56 : vector<1x16xf32>
    %58 = vector.broadcast %57 : vector<1x16xf32> to vector<8x16xf32>
    %59 = arith.subf %53, %58 : vector<8x16xf32>
    %60 = arith.mulf %59, %59 : vector<8x16xf32>
    %cst_25 = arith.constant dense<0.000000e+00> : vector<16xf32>
    %61 = vector.multi_reduction <add>, %60, %cst_25 [0] : vector<8x16xf32> to vector<16xf32>
    %62 = vector.shape_cast %61 : vector<16xf32> to vector<1x16xf32>
    %cst_26 = arith.constant 8.000000e+00 : f32
    %63 = vector.broadcast %cst_26 : f32 to vector<1x16xf32>
    %64 = arith.divf %62, %63 : vector<1x16xf32>
    %65 = vector.broadcast %57 : vector<1x16xf32> to vector<8x16xf32>
    %66 = arith.subf %53, %65 : vector<8x16xf32>
    %cst_27 = arith.constant 9.99999974E-6 : f32
    %67 = vector.broadcast %cst_27 : f32 to vector<1x16xf32>
    %68 = arith.addf %64, %67 : vector<1x16xf32>
    %69 = math.rsqrt %68 : vector<1x16xf32>
    %70 = vector.broadcast %69 : vector<1x16xf32> to vector<8x16xf32>
    %71 = arith.mulf %66, %70 : vector<8x16xf32>
    %72 = vector.extract_strided_slice %1 {offsets = [0, 2], sizes = [4, 16], strides = [1, 1]} : vector<4x20xf32> to vector<4x16xf32>
    %c0_28 = arith.constant 0 : index
    %c0_29 = arith.constant 0 : index
    %73 = vector.load %arg5[%c0_28, %c0_29] : memref<8x4xf32, #tpu.memory_space<vmem>>, vector<8x4xf32>
    %cst_30 = arith.constant dense<0.000000e+00> : vector<8x16xf32>
    %74 = tpu.matmul %73, %72, %cst_30 {dimension_numbers = #tpu.dot_dimension_numbers<[1], [0], [0], [1], [0, 0, 1, 1], [], []>} : vector<8x4xf32>, vector<4x16xf32>, vector<8x16xf32> -> vector<8x16xf32>
    %cst_31 = arith.constant dense<0.000000e+00> : vector<16xf32>
    %75 = vector.multi_reduction <add>, %74, %cst_31 [0] : vector<8x16xf32> to vector<16xf32>
    %76 = vector.shape_cast %75 : vector<16xf32> to vector<1x16xf32>
    %cst_32 = arith.constant 8.000000e+00 : f32
    %77 = vector.broadcast %cst_32 : f32 to vector<1x16xf32>
    %78 = arith.divf %76, %77 : vector<1x16xf32>
    %79 = vector.broadcast %78 : vector<1x16xf32> to vector<8x16xf32>
    %80 = arith.subf %74, %79 : vector<8x16xf32>
    %81 = arith.mulf %80, %80 : vector<8x16xf32>
    %cst_33 = arith.constant dense<0.000000e+00> : vector<16xf32>
    %82 = vector.multi_reduction <add>, %81, %cst_33 [0] : vector<8x16xf32> to vector<16xf32>
    %83 = vector.shape_cast %82 : vector<16xf32> to vector<1x16xf32>
    %cst_34 = arith.constant 8.000000e+00 : f32
    %84 = vector.broadcast %cst_34 : f32 to vector<1x16xf32>
    %85 = arith.divf %83, %84 : vector<1x16xf32>
    %86 = vector.broadcast %78 : vector<1x16xf32> to vector<8x16xf32>
    %87 = arith.subf %74, %86 : vector<8x16xf32>
    %cst_35 = arith.constant 9.99999974E-6 : f32
    %88 = vector.broadcast %cst_35 : f32 to vector<1x16xf32>
    %89 = arith.addf %85, %88 : vector<1x16xf32>
    %90 = math.rsqrt %89 : vector<1x16xf32>
    %91 = vector.broadcast %90 : vector<1x16xf32> to vector<8x16xf32>
    %92 = arith.mulf %87, %91 : vector<8x16xf32>
    %93 = arith.addf %71, %92 : vector<8x16xf32>
    %cst_36 = arith.constant 0.000000e+00 : f32
    %94 = vector.broadcast %cst_36 : f32 to vector<8x16xf32>
    %95 = arith.maximumf %93, %94 : vector<8x16xf32>
    %c0_37 = arith.constant 0 : index
    %c0_38 = arith.constant 0 : index
    %c0_39 = arith.constant 0 : index
    %96 = vector.load %arg6[%c0_37, %c0_38, %c0_39] : memref<1x8x16xf32, #tpu.memory_space<vmem>>, vector<1x8x16xf32>
    %97 = vector.shape_cast %96 : vector<1x8x16xf32> to vector<8x16xf32>
    %98 = vector.shape_cast %95 : vector<8x16xf32> to vector<1x8x16xf32>
    tpu.vector_store %arg6[%c0_37, %c0_38, %c0_39], %98 {strides = array<i32>} : memref<1x8x16xf32, #tpu.memory_space<vmem>>, vector<1x8x16xf32>,
    return
  }
  func.func @transform_0(%arg0: i32, %arg1: i32) -> (i32, i32, i32, i32) {
    %c0_i32 = arith.constant 0 : i32
    %c0_i32_0 = arith.constant 0 : i32
    %c0_i32_1 = arith.constant 0 : i32
    return %arg0, %arg1, %c0_i32, %c0_i32_0 : i32, i32, i32, i32
  }
  func.func @transform_1(%arg0: i32, %arg1: i32) -> (i32, i32, i32) {
    %c0_i32 = arith.constant 0 : i32
    %c0_i32_0 = arith.constant 0 : i32
    %c0_i32_1 = arith.constant 0 : i32
    %c0_i32_2 = arith.constant 0 : i32
    return %c0_i32, %c0_i32_0, %c0_i32_1 : i32, i32, i32
  }
  func.func @transform_2(%arg0: i32, %arg1: i32) -> (i32, i32) {
    %c0_i32 = arith.constant 0 : i32
    %c0_i32_0 = arith.constant 0 : i32
    %c0_i32_1 = arith.constant 0 : i32
    return %c0_i32, %c0_i32_0 : i32, i32
  }
  func.func @transform_3(%arg0: i32, %arg1: i32) -> (i32, i32) {
    %c0_i32 = arith.constant 0 : i32
    %c0_i32_0 = arith.constant 0 : i32
    %c0_i32_1 = arith.constant 0 : i32
    return %c0_i32, %c0_i32_0 : i32, i32
  }
  func.func @transform_4(%arg0: i32, %arg1: i32) -> (i32, i32, i32) {
    %c0_i32 = arith.constant 0 : i32
    %c0_i32_0 = arith.constant 0 : i32
    return %arg0, %c0_i32, %arg1 : i32, i32, i32
  }
}

</mosaic_0001>

<bundles_post_ra>
// kernel: resblockv2_forward.1
= control target key start
LH: loop header
LB: loop body
LE: loop exit
PB: predicated region body
PF: predicated region fallthrough
CT: control target
= control target key end

     0   :  { %9 = vsyncpa [#allocation3], 0  ;;  %s1189_s0 = inlined_call_operand.vmem [shape: f32[2,1,4,20], index: 0, kind: input, shape index: {}]   ;;  %s1190_s1 = inlined_call_operand.vmem [shape: f32[3,8,4], index: 1, kind: input, shape index: {}]   ;;  %s1191_s2 = inlined_call_operand.vmem [shape: f32[8,24], index: 2, kind: input, shape index: {}]   ;;  %s1192_s3 = inlined_call_operand.vmem [shape: f32[8,4], index: 3, kind: input, shape index: {}]   ;;  %s1193_s4 = inlined_call_operand.hbm [shape: f32[2,8,16], index: 4, kind: output, shape index: {}]  }
   0x1   :  { %11 = vsyncpa [#allocation3 + $0x1], 0  ;;  %s1030_s15 = smov 0   ;;  %s1032_s16 = smov 0  }
   0x2   :  { %s1034_s17 = smov 0   ;;  %s1036_s18 = smov 0  }
   0x3   :  { %s1038_s19 = smov 0   ;;  %s1040_s20 = smov 0  }
   0x4 LB: > { %s779_s21 = sadd.s32 4294967295, %s996_s20   ;;  %s780_s22 = sadd.s32 4294967294, %s996_s20   ;;  %s996_s20 = sphi %s1040_s20, %s17_s20   ;;  %s992_s19 = sphi %s1038_s19, %s1200_s19   ;;  %s988_s18 = sphi %s1036_s18, %s1199_s18   ;;  %s984_s17 = sphi %s1034_s17, %s1198_s17   ;;  %s980_s16 = sphi %s1032_s16, %s1197_s16   ;;  %s976_s15 = sphi %s1030_s15, %s1196_s15  }
   0x5   : > { %s29_s23 = sadd.s32 1, %s992_s19  ;;  %s129_s24 = sadd.s32 1, %s984_s17 }
   0x6   : > { %p31_p0 = scmp.ge.s32.totalorder %s29_s23, 2  ;;  %p139_p1 = scmp.ne.s32.totalorder %s984_s17, %s980_s16 }
   0x7   : > { %p140_p2 = scmp.eq.s32.totalorder %s779_s21, 1  ;;  %p145_p3 = scmp.ne.s32.totalorder %s980_s16, %s976_s15 }
   0x8   : > { %s1202_s23 = smov (%p31_p0, %s29_s23), 0  ;;  %p146_p5 = scmp.eq.s32.totalorder %s780_s22, 1 }
   0x9   : > { %p1070_p4 = por %p140_p2, %p139_p1  ;;  %s124_s26 = ssub.s32 %s992_s19, %s1202_s23 }
   0xa   : > { %p783_p6 = scmp.ge.s32.totalorder %s996_s20, 1  ;;  %p127_p7 = scmp.eq.s32.totalorder %s124_s26, 0 }
   0xb   : > { %p1077_p8 = por %p146_p5, %p145_p3  ;;  %p183_p9 = scmp.lt.s32.totalorder %s996_s20, 3 }
   0xc   : > { %s1083_s28 = scalar_select %p127_p7, %s984_s17, %s129_s24  }
   0xd   : > { %p184_p10 = pnand %p783_p6, %p183_p9 }
   0xe   : > { %p211_p11 = scmp.lt.s32.totalorder (!%p184_p10), %s988_s18, 1  ;;  %v998_v0 = vmov (!%p184_p10), 0.0   ;;  %vm999_vm0 = vmmov (!%p184_p10), 0   ;;  %s1000_s8 = smov (!%p184_p10), 127   ;;  %vm229_vm1 = vcmask (!%p184_p10), 1043456   ;;  %v786_v2 = vld [vmem:[%s1190_s1 + $0x8] sm:$0xff] (!%p184_p10)  ;;  %v483_v27 = vlaneseq (!%p184_p10) }
   0xf   : > { %187 = sbr.rel (%p184_p10) target bundleno = 828 (0x33c), region = 36  ;;  %814 = vmatprep.subr.mxu0 (!%p184_p10), %v998_v0  ;;  %816 = vmatprep.mubr.msk.f32.mxu0 (!%p184_p10), %vm999_vm0, %v998_v0  ;;  %s1001_s9 = smov (!%p184_p10), 126   ;;  %vm225_vm2 = vcmask (!%p184_p10), 31744   ;;  %v219_v4 = vld [vmem:[%s1190_s1] sm:$0xff] (!%p184_p10)  ;;  %v791_v6 = vld [vmem:[%s1190_s1 + $0x10] sm:$0xff] (!%p184_p10)  ;;  %vm457_vm3 = vcmask (!%p184_p10), 146432  }
  0x10   : > { %835 = vmatprep.mubr.msk.f32.mxu1 (!%p184_p10), %vm999_vm0, %v998_v0  ;;  %v484_v29 = vand.u32 (!%p184_p10), 127, %v483_v27  ;;  %v1002_v30 = vmov (!%p184_p10), 0.0|0.0   ;;  %vm1003_vm7 = vmmov (!%p184_p10), 1   ;;  %v498_v38 = vld [vmem:[%s1191_s2] sm:$0xff] (!%p184_p10)  ;;  %vm499_vm9 = vcmask (!%p184_p10), 195584   ;;  %s799_s6 = sshll.u32 (!%p184_p10), %s988_s18, 7 }
  0x11   : > { %843 = vmatprep.subr.bf16.mxu1 (!%p184_p10), %v1002_v30  ;;  %v595_v40 = vld [vmem:[%s1192_s3] sm:$0xff] (!%p184_p10)  ;;  %vm573_vm10 = vcmask (!%p184_p10), 130048   ;;  %s1141_s11 = scalar_lea.hbm (!%p184_p10), %s1193_s4, %s799_s6 }
  0x12   : > { %v486_v31 = vadd.s32 (!%p184_p10), 4294967295, %v484_v29 }
  0x14   : > { %vm487_vm4 = vcmp.ge.s32.totalorder (!%p184_p10), %v486_v31, 0  ;;  %vm488_vm5 = vcmp.lt.s32.totalorder (!%p184_p10), %v486_v31, 16 }
  0x15   : > { %vm489_vm6 = vmand (!%p184_p10), %vm487_vm4, %vm488_vm5 }
  0x16   : > { %s212_s29 = scalar_select %p211_p11, %s988_s18, 1  ;;  %vm845_vm8 = vmpackc.low %vm1003_vm7, %vm489_vm6 }
  0x17   : > { %s1004_s18 = smov [#allocation2]  }
  0x18   : > { %s785_s30 = sshll.u32 %s212_s29, 2  ;;  %s922_s14 = sshll.u32 %s1004_s18, 4  ;;  %s923_s14 = int_to_ptr.vmem [resolvable:$false] %s922_s14 }
  0x19   : > { %s217_s7 = scalar_lea.vmem %s1189_s0, %s785_s30  ;;  %s208_s30 = sand.u32 1, %s980_s16  }
  0x1a   : > { %v218_v1 = vld [vmem:[%s217_s7] sm:$0xf]  ;;  %s784_s5 = sshll.u32 %s208_s30, 3  ;;  %s694_s12 = scalar_lea.sflag [#allocation3], %s208_s30 }
  0x1b   : > { %223 = vrot.lane.b32.xlu0 %v218_v1, %s1000_s8  ;;  %s210_s7 = scalar_lea.vmem [#allocation2], %s784_s5  ;;  %s924_s21 = scalar_lea.vmem %s923_s14, 256 }
  0x1f   : > { %379 = vrot.lane.b32.xlu0 %v218_v1, %s1001_s9 }
  0x8d   : > { %v224_v3 = vpop.permute.xlu0 %223 }
  0x8e   : > { %815 = vmatpush3.msk.msra.mxu0 %vm229_vm1, %v224_v3 }
  0x8f   : > { %817 = vmatmul.mubr.msk.f32.vlgmr.msra.gmra.mrb[0].mxu0 %vm225_vm2, %v786_v2  ;;  %819 = vmatprep.subr.mxu0 %v998_v0 }
  0x90   : > { %820 = vmatpush3.msk.msra.mxu0 %vm229_vm1, %v218_v1  ;;  %821 = vmatprep.mubr.msk.f32.mxu0 %vm999_vm0, %v998_v0 }
  0x91   : > { %824 = vmatprep.subr.mxu0 %v998_v0  ;;  %v380_v5 = vpop.permute.xlu0 %379 }
  0x97   : > { %822 = vmatmul.mubr.msk.f32.vlgmr.msra.gmra.mrb[0].mxu0 %vm225_vm2, %v219_v4 }
  0x98   : > { %825 = vmatpush3.msk.msra.mxu0 %vm229_vm1, %v380_v5  ;;  %826 = vmatprep.mubr.msk.f32.mxu0 %vm999_vm0, %v998_v0 }
  0x9f   : > { %827 = vmatmul.mubr.msk.f32.vlgmr.msra.gmra.mrb[0].mxu0 %vm225_vm2, %v791_v6 }
 0x172   : > { %v452_v7 = vpop.f32.mrb[0].mxu0 }
 0x173   : > { %v458_v8 = vsel %vm457_vm3, %v452_v7, 0.0  ;;  %v828_v9 = vpop.f32.mrb[1].mxu0 }
 0x174   : > { %v459_v10 = vrot.slane %v458_v8, 4 }
 0x176   : > { %v460_v11 = vadd.f32 %v459_v10, %v458_v8 }
 0x178   : > { %v461_v12 = vrot.slane %v460_v11, 2 }
 0x17a   : > { %v462_v13 = vadd.f32 %v461_v12, %v460_v11 }
 0x17c   : > { %v463_v14 = vrot.slane %v462_v13, 1 }
 0x17e   : > { %v464_v15 = vadd.f32 %v463_v14, %v462_v13 }
 0x180   : > { %v466_v16 = vmul.f32 0.125, %v464_v15 }
 0x182   : > { %v467_v17 = vsub.f32 %v452_v7, %v466_v16 }
 0x184   : > { %v468_v18 = vmul.f32 %v467_v17, %v467_v17 }
 0x186   : > { %v469_v19 = vsel %vm457_vm3, %v468_v18, 0.0 }
 0x187   : > { %v470_v20 = vrot.slane %v469_v19, 4 }
 0x189   : > { %v471_v21 = vadd.f32 %v470_v20, %v469_v19 }
 0x18b   : > { %v472_v22 = vrot.slane %v471_v21, 2 }
 0x18d   : > { %v473_v23 = vadd.f32 %v472_v22, %v471_v21 }
 0x18f   : > { %v474_v24 = vrot.slane %v473_v23, 1 }
 0x191   : > { %v475_v25 = vadd.f32 %v474_v24, %v473_v23 }
 0x193   : > { %v476_v26 = vmul.f32 0.125, %v475_v25 }
 0x195   : > { %v477_v28 = vadd.f32 1e-05, %v476_v26 }
 0x197   : > { %912 = vrsqrt.f32 %v477_v28 }
 0x1a1   : > { %v913_v32 = vpop.eup %912 }
 0x1a2   : > { %v479_v33 = vmul.f32 %v913_v32, %v467_v17 }
 0x1a4   : > { %v480_v34 = vmax.f32 %v479_v33, 0.0 }
 0x1a6   : > { %v490_v35 = vsel %vm489_vm6, %v480_v34, 0.0 }
 0x1a7   : > { %492 = vrot.lane.b32.xlu1 %v490_v35, %s1000_s8  ;;  %s708_s8 = sshll.u32 %s210_s7, 4  ;;  %s1143_s8 = int_to_ptr.vmem [resolvable:$true] %s708_s8 }
 0x1a8   : > { %s918_s13 = scalar_lea.vmem %s1143_s8, 128  ;;  %p925_p1 = scmp.lt.s32.totalorder %s1143_s8, %s923_s14 }
 0x1a9   : > { %p919_p12 = scmp.ne.s32.totalorder %s1143_s8, %s918_s13  ;;  %p926_p2 = scmp.lt.s32.totalorder %s924_s21, %s918_s13 }
 0x1ab   : > { %495 = vrot.lane.b32.xlu1 %v490_v35, %s1001_s9  ;;  %p920_p13 = pnand %p919_p12, %p1070_p4  ;;  %p927_p3 = por %p926_p2, %p925_p1 }
 0x1ad   : > { %p921_p0 = pneg %p920_p13 }
 0x1af   : > { %p928_p5 = pnand %p927_p3, %p921_p0 }
 0x219   : > { %v493_v36 = vpop.permute.xlu1 %492 }
 0x21a   : > { %v844_v37 = vpack.c.bf16 %v493_v36, %v480_v34 }
 0x21c   : > { %846 = vmatpush3.bf16.msk.msra.mxu1 %vm845_vm8, %v844_v37 }
 0x21d   : > { %833 = vmatprep.subr.mxu1 %v998_v0  ;;  %v496_v39 = vpop.permute.xlu1 %495 }
 0x220   : > { %834 = vmatpush3.msra.mxu1 %v496_v39 }
 0x221   : > { %836 = vmatmul.mubr.msk.f32.vlgmr.msra.gmra.mrb[0].mxu1 %vm499_vm9, %v498_v38  ;;  %838 = vmatprep.subr.mxu1 %v998_v0 }
 0x222   : > { %839 = vmatpush3.msk.msra.mxu1 %vm229_vm1, %v380_v5  ;;  %840 = vmatprep.mubr.msk.f32.mxu1 %vm999_vm0, %v998_v0 }
 0x225   : > { %841 = vmatmul.mubr.msk.f32.vlgmr.msra.gmra.mrb[2].mxu1 %vm225_vm2, %v595_v40 }
 0x2f4   : > { %v569_v41 = vpop.f32.mrb[0].mxu1 }
 0x2f5   : > { %v574_v42 = vsel %vm573_vm10, %v569_v41, 0.0  ;;  %v837_v43 = vpop.f32.mrb[1].mxu1 }
 0x2f6   : > { %v575_v44 = vrot.slane %v574_v42, 4 }
 0x2f8   : > { %v576_v45 = vadd.f32 %v575_v44, %v574_v42  ;;  %v665_v46 = vpop.f32.mrb[2].mxu1 }
 0x2f9   : > { %v669_v47 = vsel %vm573_vm10, %v665_v46, 0.0  ;;  %v842_v48 = vpop.f32.mrb[3].mxu1 }
 0x2fa   : > { %v577_v49 = vrot.slane %v576_v45, 2  ;;  %v670_v50 = vrot.slane %v669_v47, 4 }
 0x2fc   : > { %v578_v51 = vadd.f32 %v577_v49, %v576_v45  ;;  %v671_v52 = vadd.f32 %v670_v50, %v669_v47 }
 0x2fe   : > { %v579_v53 = vrot.slane %v578_v51, 1  ;;  %v672_v54 = vrot.slane %v671_v52, 2 }
 0x300   : > { %v580_v55 = vadd.f32 %v579_v53, %v578_v51  ;;  %v673_v56 = vadd.f32 %v672_v54, %v671_v52 }
 0x302   : > { %v581_v57 = vmul.f32 0.125, %v580_v55  ;;  %v674_v58 = vrot.slane %v673_v56, 1 }
 0x304   : > { %v582_v59 = vsub.f32 %v569_v41, %v581_v57  ;;  %v675_v60 = vadd.f32 %v674_v58, %v673_v56 }
 0x306   : > { %v583_v61 = vmul.f32 %v582_v59, %v582_v59  ;;  %v676_v62 = vmul.f32 0.125, %v675_v60 }
 0x308   : > { %v584_v63 = vsel %vm573_vm10, %v583_v61, 0.0  ;;  %v677_v0 = vsub.f32 %v665_v46, %v676_v62 }
 0x309   : > { %v585_v1 = vrot.slane %v584_v63, 4 }
 0x30a   : > { %v678_v2 = vmul.f32 %v677_v0, %v677_v0 }
 0x30b   : > { %v586_v3 = vadd.f32 %v585_v1, %v584_v63 }
 0x30c   : > { %v679_v4 = vsel %vm573_vm10, %v678_v2, 0.0 }
 0x30d   : > { %v587_v5 = vrot.slane %v586_v3, 2  ;;  %v680_v6 = vrot.slane %v679_v4, 4 }
 0x30f   : > { %v588_v7 = vadd.f32 %v587_v5, %v586_v3  ;;  %v681_v8 = vadd.f32 %v680_v6, %v679_v4 }
 0x311   : > { %v589_v9 = vrot.slane %v588_v7, 1  ;;  %v682_v10 = vrot.slane %v681_v8, 2 }
 0x313   : > { %v590_v11 = vadd.f32 %v589_v9, %v588_v7  ;;  %v683_v12 = vadd.f32 %v682_v10, %v681_v8 }
 0x315   : > { %v591_v13 = vmul.f32 0.125, %v590_v11  ;;  %v684_v14 = vrot.slane %v683_v12, 1 }
 0x317   : > { %v592_v15 = vadd.f32 1e-05, %v591_v13  ;;  %v685_v16 = vadd.f32 %v684_v14, %v683_v12 }
 0x319   : > { %v686_v17 = vmul.f32 0.125, %v685_v16  ;;  %914 = vrsqrt.f32 %v592_v15 }
 0x31b   : > { %v687_v18 = vadd.f32 1e-05, %v686_v17 }
 0x31d   : > { %916 = vrsqrt.f32 %v687_v18 }
 0x323   : > { %v915_v19 = vpop.eup %914 }
 0x324   : > { %v594_v21 = vmul.f32 %v915_v19, %v582_v59 }
 0x327   : > { %v917_v20 = vpop.eup %916 }
 0x328   : > { %v689_v22 = vmul.f32 %v917_v20, %v677_v0 }
 0x32a   : > { %v690_v23 = vadd.f32 %v689_v22, %v594_v21 }
 0x32c   : > { %v691_v24 = vmax.f32 %v690_v23, 0.0 }
 0x32e   : > { %692 = vst.msk [vmem:[%s210_s7] sm:$0xff] %vm573_vm10, %v691_v24 }
 0x32f   : > { %931 = shalt.err (!%p928_p5)
}
 0x330   : > { %s932_s22 = scalar_lea.hbm %s1141_s11, 128  ;;  %s936_s29 = scalar_lea.hbm %s1193_s4, 256 }
 0x331   : > { %p933_p6 = scmp.ne.s32.totalorder %s1141_s11, %s932_s22  ;;  %p937_p10 = scmp.lt.u32.totalorder %s1141_s11, %s1193_s4 }
 0x332   : > { %p938_p11 = scmp.lt.u32.totalorder %s936_s29, %s932_s22  ;;  %p940_p13 = scmp.lt.u32.totalorder %s932_s22, %s1141_s11 }
 0x333   : > { %p934_p7 = pnand %p933_p6, %p1070_p4 }
 0x334   : > { %p939_p12 = por %p938_p11, %p937_p10 }
 0x335   : > { %p935_p9 = pneg %p934_p7 }
 0x336   : > { %p941_p0 = por %p940_p13, %p939_p12 }
 0x338   : > { %p942_p1 = pnand %p941_p0, %p935_p9 }
 0x33a   : > { %945 = shalt.err (!%p942_p1)
}
 0x33b   : > { %851 = dma.vmem_to_hbm [thread:$0]  (%p1070_p4), %s1143_s8, 128, %s1141_s11, %s694_s12  }
 0x33c PF: > { %p857_p2 = scmp.ge.s32.totalorder %s996_s20, 2  ;;  %s720_s6 = sand.u32 1, %s976_s15  }
 0x33d   : > { %s721_s7 = scalar_lea.sflag [#allocation3], %s720_s6 }
 0x33e   : > { %p854_p3 = pnand %p857_p2, %p1077_p8 }
 0x340   : > { %971 = dma.done.wait (!%p854_p3), %s721_s7, 128  }
 0x341   : > { %973 = vsyncadd (!%p854_p3), %s721_s7, 4294967168  ;;  %s17_s20 = sadd.s32 1, %s996_s20   ;;  %s1196_s15 = smov %s980_s16 }
 0x342   : > { %p14_p5 = scmp.ge.s32.totalorder %s17_s20, 4   ;;  %s1197_s16 = smov %s984_s17 }
 0x343   : > { %s1198_s17 = smov %s1083_s28  ;;  %s1199_s18 = smov %s992_s19 }
 0x344   : > { %s1200_s19 = smov %s1202_s23  ;;  %16 = sbr.rel (!%p14_p5) target bundleno = 4 (0x4), region = 73 }
 0x34b   :  { %726 = vsyncpa [#allocation3], 1 }
 0x34c   :  { %728 = vsyncpa [#allocation3 + $0x1], 1 }

</bundles_post_ra>
